<compile_context>
chip_gen: v7x
topology: tpu7x:2x2x1
jax: 0.10.0
libtpu: 0.0.40
codegen_flags: <defaults>
</compile_context>

<pallas_src>
import functools

import jax
import jax.numpy as jnp
from jax import lax
from jax.experimental import pallas as pl
from jax.experimental.pallas import tpu as pltpu

# ----------------------- deterministic "opt" configuration ------------------------
POS_MARGIN = 0.0   # opt.loss_contrastive_pos_margin
NEG_MARGIN = 1.0   # opt.loss_contrastive_neg_margin
LAM_EMB = 1.0      # opt.lam_emb
LAM_DIV = 0.0      # opt.lam_div
GROUP_NAME = ''    # opt.group_name  -> non-group path (no diversity loss)

_NORM_EPS = 1e-12  # F.normalize eps
_PDIST_EPS = 1e-6  # nn.PairwiseDistance eps (added to the difference)

_LANE = 128
_SUBLANE = 8
_VMEM_LIMIT_BYTES = 32 * 1024 * 1024   # safe on v5e (128 MiB phys), v6e (128), v7x (64)


def _round_up(x, m):
    return (x + m - 1) // m * m


def _input_vmem_budget_bytes():
    """Bytes allowed for double-buffered kernel inputs, sized from the real VMEM."""
    try:
        cap = int(pltpu.get_tpu_info().vmem_capacity_bytes)
    except Exception:
        cap = 64 << 20   # conservative fallback: v7x per-TensorCore VMEM
    return max(1 << 20, min(cap // 4, 8 << 20))


# ------------------------- Pallas kernel 1: L2-normalize once ----------------------
def _l2_normalize_kernel(x_ref, o_ref):
    x = x_ref[...].astype(jnp.float32)
    s = jnp.sum(x * x, axis=-1, keepdims=True)
    # rsqrt(max(s, eps^2)) == 1 / max(sqrt(s), eps) exactly (sqrt is monotone and
    # eps^2 = 1e-24 is representable in f32), so all-zero rows map to zero just like
    # F.normalize.  rsqrt runs on the EUP slot instead of a VPU divide.
    inv = lax.rsqrt(jnp.maximum(s, _NORM_EPS * _NORM_EPS))
    o_ref[...] = (x * inv).astype(o_ref.dtype)


def _l2_normalize(batch):
    n, d = batch.shape
    budget = _input_vmem_budget_bytes()
    # 1 input + 1 output, double-buffered, f32.
    tile_n = max(_SUBLANE, (budget // (2 * 2 * d * 4)) // _SUBLANE * _SUBLANE)
    tile_n = min(tile_n, _round_up(n, _SUBLANE))
    n_pad = _round_up(n, tile_n)
    x = jnp.pad(batch.astype(jnp.float32), ((0, n_pad - n), (0, 0)))

    out = pl.pallas_call(
        _l2_normalize_kernel,
        out_shape=jax.ShapeDtypeStruct((n_pad, d), jnp.float32),
        grid_spec=pltpu.PrefetchScalarGridSpec(
            num_scalar_prefetch=0,
            grid=(n_pad // tile_n,),
            in_specs=[pl.BlockSpec((tile_n, d), lambda i: (i, 0))],
            out_specs=pl.BlockSpec((tile_n, d), lambda i: (i, 0)),
        ),
        compiler_params=pltpu.CompilerParams(
            dimension_semantics=("parallel",),
            vmem_limit_bytes=_VMEM_LIMIT_BYTES),
    )(x)
    return out   # (n_pad, d); padded rows are zero


# ------------------- Pallas kernel 2: tiled triplet hinge partial sums -------------
def _triplet_tile_kernel(a_ref, p_ref, n_ref, pos_ref, neg_ref, *,
                         tile_t, total_triplets, pos_margin, neg_margin):
    t = pl.program_id(0)

    a = a_ref[...]            # rows are already L2-normalized
    p = p_ref[...]
    n = n_ref[...]

    # torch.nn.PairwiseDistance(p=2): ||x1 - x2 + eps||_2
    d_pos = jnp.sqrt(jnp.sum((a - p + _PDIST_EPS) ** 2, axis=-1, keepdims=True))
    d_neg = jnp.sqrt(jnp.sum((a - n + _PDIST_EPS) ** 2, axis=-1, keepdims=True))

    if pos_margin != 0.0:
        hinge_pos = jnp.maximum(d_pos - pos_margin, 0.0)
    else:
        hinge_pos = d_pos     # d_pos >= 0, so relu(d_pos - 0) == d_pos
    hinge_neg = jnp.maximum(neg_margin - d_neg, 0.0)

    # Mask out padded rows of the last tile (divide by the real T outside).
    row = t * tile_t + lax.broadcasted_iota(jnp.int32, (tile_t, 1), 0)
    valid = (row < total_triplets).astype(jnp.float32)

    pos_partial = jnp.sum(hinge_pos * valid)
    neg_partial = jnp.sum(hinge_neg * valid)

    # Lane-dense (1, 8, 128) partial-sum slabs; grid axis is "parallel" so both
    # TensorCores on v7x participate.  Final tiny reduction happens in JAX.
    pos_ref[...] = jnp.broadcast_to(pos_partial, pos_ref.shape).astype(jnp.float32)
    neg_ref[...] = jnp.broadcast_to(neg_partial, neg_ref.shape).astype(jnp.float32)


# ------------------------------------ wrapper ---------------------------------------
@jax.jit
def contrastive_pallas(batch, anchors, positives, negatives):
    """batch: (N, D) float32; anchors/positives/negatives: (T,) int32 triplet indices.

    Returns (loss, loss_emb, loss_div) matching Criterion.forward (group_name == '').
    """
    n, d = batch.shape
    t_real = anchors.shape[0]

    # Normalize once over N rows (not 3T gathered rows).
    b_norm = _l2_normalize(batch)

    budget = _input_vmem_budget_bytes()
    # 3 inputs, double-buffered, f32.
    tile_t = max(_SUBLANE, (budget // (3 * 2 * d * 4)) // _SUBLANE * _SUBLANE)
    tile_t = min(tile_t, _round_up(t_real, _SUBLANE))
    t_pad = _round_up(t_real, tile_t)
    num_tiles = t_pad // tile_t

    pad = (0, t_pad - t_real)
    a_idx = jnp.pad(anchors.astype(jnp.int32), pad)
    p_idx = jnp.pad(positives.astype(jnp.int32), pad)
    n_idx = jnp.pad(negatives.astype(jnp.int32), pad)

    # Gather *normalized* rows so the (T, D) intermediates carry finished work.
    # TODO(synk): a fully fused variant would DMA rows straight from b_norm using
    # scalar-prefetched indices instead of materializing three (T, D) arrays in HBM.
    a = b_norm[a_idx]
    p = b_norm[p_idx]
    ng = b_norm[n_idx]

    kernel = functools.partial(
        _triplet_tile_kernel,
        tile_t=tile_t, total_triplets=t_real,
        pos_margin=POS_MARGIN, neg_margin=NEG_MARGIN)

    row_spec = pl.BlockSpec((tile_t, d), lambda i: (i, 0))
    part_spec = pl.BlockSpec((1, _SUBLANE, _LANE), lambda i: (i, 0, 0))

    pos_part, neg_part = pl.pallas_call(
        kernel,
        out_shape=(jax.ShapeDtypeStruct((num_tiles, _SUBLANE, _LANE), jnp.float32),
                   jax.ShapeDtypeStruct((num_tiles, _SUBLANE, _LANE), jnp.float32)),
        grid_spec=pltpu.PrefetchScalarGridSpec(
            num_scalar_prefetch=0,
            grid=(num_tiles,),
            in_specs=[row_spec, row_spec, row_spec],
            out_specs=[part_spec, part_spec],
        ),
        compiler_params=pltpu.CompilerParams(
            dimension_semantics=("parallel",),
            vmem_limit_bytes=_VMEM_LIMIT_BYTES),
    )(a, p, ng)

    pos_sum = jnp.sum(pos_part[:, 0, 0])
    neg_sum = jnp.sum(neg_part[:, 0, 0])

    inv_t = jnp.float32(1.0 / t_real)
    loss_emb = (pos_sum + neg_sum) * inv_t
    loss_div = jnp.float32(0.0)          # group_name == '' path: no diversity loss
    loss = LAM_EMB * loss_emb + LAM_DIV * loss_div
    return loss, loss_emb, loss_div


# ------------------------------ deterministic miner --------------------------------
def random_batchminer(key, labels):
    # TODO(synk): the real batchminer is an external plug-in (batchminer.BATCHMINING_METHODS);
    # this is a deterministic random-triplet stand-in (same-label positive, diff-label negative).
    num = labels.shape[0]
    anchors = jnp.arange(num, dtype=jnp.int32)
    same = (labels[:, None] == labels[None, :]) & ~jnp.eye(num, dtype=bool)
    diff = labels[:, None] != labels[None, :]
    kp, kn = jax.random.split(key)
    positives = jnp.argmax(jnp.where(same, jax.random.uniform(kp, (num, num)), -1.0),
                           axis=1).astype(jnp.int32)
    negatives = jnp.argmax(jnp.where(diff, jax.random.uniform(kn, (num, num)), -1.0),
                           axis=1).astype(jnp.int32)
    return anchors, positives, negatives


# ------------------------------- pure-JAX reference ---------------------------------
def contrastive_ref(batch, anchors, positives, negatives):
    b = batch / jnp.maximum(jnp.linalg.norm(batch, axis=-1, keepdims=True), _NORM_EPS)
    d_pos = jnp.linalg.norm(b[anchors] - b[positives] + _PDIST_EPS, axis=-1)
    d_neg = jnp.linalg.norm(b[anchors] - b[negatives] + _PDIST_EPS, axis=-1)
    pos = jnp.mean(jnp.maximum(d_pos - POS_MARGIN, 0.0))
    neg = jnp.mean(jnp.maximum(NEG_MARGIN - d_neg, 0.0))
    loss_emb = pos + neg
    loss_div = jnp.float32(0.0)
    return LAM_EMB * loss_emb + LAM_DIV * loss_div, loss_emb, loss_div


if __name__ == "__main__":
    key = jax.random.PRNGKey(0)
    k_batch, k_mine = jax.random.split(key)

    N, D = 32, 128   # lane-dense embedding dim (multiple of 128)
    batch = jax.random.normal(k_batch, (N, D), dtype=jnp.float32)
    labels = jnp.repeat(jnp.arange(4, dtype=jnp.int32), 8)   # 4 classes x 8 samples

    anchors, positives, negatives = random_batchminer(k_mine, labels)

    loss, loss_emb, loss_div = contrastive_pallas(batch, anchors, positives, negatives)
    jax.block_until_ready((loss, loss_emb, loss_div))

    r_loss, r_emb, r_div = contrastive_ref(batch, anchors, positives, negatives)
    assert jnp.allclose(loss, r_loss, atol=1e-5), (loss, r_loss)
    assert jnp.allclose(loss_emb, r_emb, atol=1e-5), (loss_emb, r_emb)
    assert jnp.allclose(loss_div, r_div, atol=1e-6), (loss_div, r_div)

    print("KERNEL_OK")
</pallas_src>

<mosaic_0001>
module attributes {stable_mosaic.version = 11 : i64} {
  func.func @_l2_normalize_kernel(%arg0: i32, %arg1: memref<32x128xf32, #tpu.memory_space<vmem>>, %arg2: memref<32x128xf32, #tpu.memory_space<vmem>>) attributes {dimension_semantics = [#tpu.dimension_semantics<parallel>], iteration_bounds = array<i64: 1>, scalar_prefetch = 0 : i64, scratch_operands = 0 : i64, tpu.core_type = #tpu.core_type<tc>, window_params = [{transform_indices = @transform_0, window_bounds = array<i64: 32, 128>}, {transform_indices = @transform_1, window_bounds = array<i64: 32, 128>}]} {
    %c0 = arith.constant 0 : index
    %c0_0 = arith.constant 0 : index
    %0 = vector.load %arg1[%c0, %c0_0] : memref<32x128xf32, #tpu.memory_space<vmem>>, vector<32x128xf32>
    %1 = arith.mulf %0, %0 : vector<32x128xf32>
    %cst = arith.constant dense<0.000000e+00> : vector<32xf32>
    %2 = vector.multi_reduction <add>, %1, %cst [1] : vector<32x128xf32> to vector<32xf32>
    %3 = vector.shape_cast %2 : vector<32xf32> to vector<32x1xf32>
    %cst_1 = arith.constant 1.000000e-24 : f32
    %4 = vector.broadcast %cst_1 : f32 to vector<32x1xf32>
    %5 = arith.maximumf %3, %4 : vector<32x1xf32>
    %6 = math.rsqrt %5 : vector<32x1xf32>
    %7 = vector.broadcast %6 : vector<32x1xf32> to vector<32x128xf32>
    %8 = arith.mulf %0, %7 : vector<32x128xf32>
    %c0_2 = arith.constant 0 : index
    %c0_3 = arith.constant 0 : index
    %9 = vector.load %arg2[%c0_2, %c0_3] : memref<32x128xf32, #tpu.memory_space<vmem>>, vector<32x128xf32>
    tpu.vector_store %arg2[%c0_2, %c0_3], %8 {strides = array<i32>} : memref<32x128xf32, #tpu.memory_space<vmem>>, vector<32x128xf32>,
    return
  }
  func.func @transform_0(%arg0: i32) -> (i32, i32) {
    %c0_i32 = arith.constant 0 : i32
    %c0_i32_0 = arith.constant 0 : i32
    return %arg0, %c0_i32 : i32, i32
  }
  func.func @transform_1(%arg0: i32) -> (i32, i32) {
    %c0_i32 = arith.constant 0 : i32
    %c0_i32_0 = arith.constant 0 : i32
    return %arg0, %c0_i32 : i32, i32
  }
}

module attributes {stable_mosaic.version = 11 : i64} {
  func.func @_triplet_tile_kernel(%arg0: i32, %arg1: memref<32x128xf32, #tpu.memory_space<vmem>>, %arg2: memref<32x128xf32, #tpu.memory_space<vmem>>, %arg3: memref<32x128xf32, #tpu.memory_space<vmem>>, %arg4: memref<1x8x128xf32, #tpu.memory_space<vmem>>, %arg5: memref<1x8x128xf32, #tpu.memory_space<vmem>>) attributes {dimension_semantics = [#tpu.dimension_semantics<parallel>], iteration_bounds = array<i64: 1>, scalar_prefetch = 0 : i64, scratch_operands = 0 : i64, tpu.core_type = #tpu.core_type<tc>, window_params = [{transform_indices = @transform_0, window_bounds = array<i64: 32, 128>}, {transform_indices = @transform_1, window_bounds = array<i64: 32, 128>}, {transform_indices = @transform_2, window_bounds = array<i64: 32, 128>}, {transform_indices = @transform_3, window_bounds = array<i64: 1, 8, 128>}, {transform_indices = @transform_4, window_bounds = array<i64: 1, 8, 128>}]} {
    %c0 = arith.constant 0 : index
    %c0_0 = arith.constant 0 : index
    %0 = vector.load %arg1[%c0, %c0_0] : memref<32x128xf32, #tpu.memory_space<vmem>>, vector<32x128xf32>
    %c0_1 = arith.constant 0 : index
    %c0_2 = arith.constant 0 : index
    %1 = vector.load %arg2[%c0_1, %c0_2] : memref<32x128xf32, #tpu.memory_space<vmem>>, vector<32x128xf32>
    %c0_3 = arith.constant 0 : index
    %c0_4 = arith.constant 0 : index
    %2 = vector.load %arg3[%c0_3, %c0_4] : memref<32x128xf32, #tpu.memory_space<vmem>>, vector<32x128xf32>
    %3 = arith.subf %0, %1 : vector<32x128xf32>
    %cst = arith.constant 9.99999997E-7 : f32
    %4 = vector.broadcast %cst : f32 to vector<32x128xf32>
    %5 = arith.addf %3, %4 : vector<32x128xf32>
    %6 = arith.mulf %5, %5 : vector<32x128xf32>
    %cst_5 = arith.constant dense<0.000000e+00> : vector<32xf32>
    %7 = vector.multi_reduction <add>, %6, %cst_5 [1] : vector<32x128xf32> to vector<32xf32>
    %8 = vector.shape_cast %7 : vector<32xf32> to vector<32x1xf32>
    %9 = math.sqrt %8 : vector<32x1xf32>
    %10 = arith.subf %0, %2 : vector<32x128xf32>
    %cst_6 = arith.constant 9.99999997E-7 : f32
    %11 = vector.broadcast %cst_6 : f32 to vector<32x128xf32>
    %12 = arith.addf %10, %11 : vector<32x128xf32>
    %13 = arith.mulf %12, %12 : vector<32x128xf32>
    %cst_7 = arith.constant dense<0.000000e+00> : vector<32xf32>
    %14 = vector.multi_reduction <add>, %13, %cst_7 [1] : vector<32x128xf32> to vector<32xf32>
    %15 = vector.shape_cast %14 : vector<32xf32> to vector<32x1xf32>
    %16 = math.sqrt %15 : vector<32x1xf32>
    %cst_8 = arith.constant 1.000000e+00 : f32
    %17 = vector.broadcast %cst_8 : f32 to vector<32x1xf32>
    %18 = arith.subf %17, %16 : vector<32x1xf32>
    %cst_9 = arith.constant 0.000000e+00 : f32
    %19 = vector.broadcast %cst_9 : f32 to vector<32x1xf32>
    %20 = arith.maximumf %18, %19 : vector<32x1xf32>
    %c32_i32 = arith.constant 32 : i32
    %21 = arith.muli %arg0, %c32_i32 : i32
    %22 = tpu.iota {dimensions = array<i32: 0>} : vector<32x1xi32>
    %23 = vector.broadcast %21 : i32 to vector<32x1xi32>
    %24 = arith.addi %23, %22 : vector<32x1xi32>
    %c32_i32_10 = arith.constant 32 : i32
    %25 = vector.broadcast %c32_i32_10 : i32 to vector<32x1xi32>
    %26 = arith.cmpi slt, %24, %25 : vector<32x1xi32>
    %27 = arith.extui %26 : vector<32x1xi1> to vector<32x1xi32>
    %28 = arith.sitofp %27 : vector<32x1xi32> to vector<32x1xf32>
    %29 = arith.mulf %9, %28 : vector<32x1xf32>
    %30 = vector.shape_cast %29 : vector<32x1xf32> to vector<1x32x1xf32>
    %cst_11 = arith.constant dense<0.000000e+00> : vector<1xf32>
    %31 = vector.multi_reduction <add>, %30, %cst_11 [1, 2] : vector<1x32x1xf32> to vector<1xf32>
    %32 = vector.shape_cast %31 : vector<1xf32> to vector<1x1x1xf32>
    %33 = vector.extract %32[0, 0, 0] : f32 from vector<1x1x1xf32>
    %34 = arith.mulf %20, %28 : vector<32x1xf32>
    %35 = vector.shape_cast %34 : vector<32x1xf32> to vector<1x32x1xf32>
    %cst_12 = arith.constant dense<0.000000e+00> : vector<1xf32>
    %36 = vector.multi_reduction <add>, %35, %cst_12 [1, 2] : vector<1x32x1xf32> to vector<1xf32>
    %37 = vector.shape_cast %36 : vector<1xf32> to vector<1x1x1xf32>
    %38 = vector.extract %37[0, 0, 0] : f32 from vector<1x1x1xf32>
    %39 = vector.broadcast %33 : f32 to vector<1x8x128xf32>
    %c0_13 = arith.constant 0 : index
    %c0_14 = arith.constant 0 : index
    %c0_15 = arith.constant 0 : index
    %40 = vector.load %arg4[%c0_13, %c0_14, %c0_15] : memref<1x8x128xf32, #tpu.memory_space<vmem>>, vector<1x8x128xf32>
    tpu.vector_store %arg4[%c0_13, %c0_14, %c0_15], %39 {strides = array<i32>} : memref<1x8x128xf32, #tpu.memory_space<vmem>>, vector<1x8x128xf32>,
    %41 = vector.broadcast %38 : f32 to vector<1x8x128xf32>
    %c0_16 = arith.constant 0 : index
    %c0_17 = arith.constant 0 : index
    %c0_18 = arith.constant 0 : index
    %42 = vector.load %arg5[%c0_16, %c0_17, %c0_18] : memref<1x8x128xf32, #tpu.memory_space<vmem>>, vector<1x8x128xf32>
    tpu.vector_store %arg5[%c0_16, %c0_17, %c0_18], %41 {strides = array<i32>} : memref<1x8x128xf32, #tpu.memory_space<vmem>>, vector<1x8x128xf32>,
    return
  }
  func.func @transform_0(%arg0: i32) -> (i32, i32) {
    %c0_i32 = arith.constant 0 : i32
    %c0_i32_0 = arith.constant 0 : i32
    return %arg0, %c0_i32 : i32, i32
  }
  func.func @transform_1(%arg0: i32) -> (i32, i32) {
    %c0_i32 = arith.constant 0 : i32
    %c0_i32_0 = arith.constant 0 : i32
    return %arg0, %c0_i32 : i32, i32
  }
  func.func @transform_2(%arg0: i32) -> (i32, i32) {
    %c0_i32 = arith.constant 0 : i32
    %c0_i32_0 = arith.constant 0 : i32
    return %arg0, %c0_i32 : i32, i32
  }
  func.func @transform_3(%arg0: i32) -> (i32, i32, i32) {
    %c0_i32 = arith.constant 0 : i32
    %c0_i32_0 = arith.constant 0 : i32
    %c0_i32_1 = arith.constant 0 : i32
    return %arg0, %c0_i32, %c0_i32_0 : i32, i32, i32
  }
  func.func @transform_4(%arg0: i32) -> (i32, i32, i32) {
    %c0_i32 = arith.constant 0 : i32
    %c0_i32_0 = arith.constant 0 : i32
    %c0_i32_1 = arith.constant 0 : i32
    return %arg0, %c0_i32, %c0_i32_0 : i32, i32, i32
  }
}

</mosaic_0001>

<bundles_post_ra>
// kernel: contrastive_pallas.2
= control target key start
LH: loop header
LB: loop body
LE: loop exit
PB: predicated region body
PF: predicated region fallthrough
CT: control target
= control target key end

     0   :  { %6 = vsyncpa [#allocation3], 0  ;;  %s94_s6 = smov [#allocation2]   ;;  %s131_s0 = inlined_call_operand.hbm [shape: f32[32,128], index: 0, kind: input, shape index: {}]   ;;  %s132_s1 = inlined_call_operand.vmem [shape: f32[32,128], index: 1, kind: output, shape index: {}]  }
   0x1   :  { %s12_s7 = sshll.u32 %s94_s6, 4  ;;  %s70_s10 = scalar_lea.hbm %s131_s0, 512  ;;  %s13_s7 = int_to_ptr.vmem [resolvable:$true] %s12_s7 }
   0x2   :  { %p71_p0 = scmp.ne.s32.totalorder %s131_s0, %s70_s10  ;;  %p74_p1 = scmp.lt.u32.totalorder %s70_s10, %s131_s0 }
   0x4   :  { %p76_p2 = pnand %p74_p1, %p71_p0 }
   0x6   :  { %79 = shalt.err (!%p76_p2)
}
   0x7   :  { %s80_s15 = scalar_lea.vmem %s13_s7, 512  ;;  %p85_p4 = scmp.lt.s32.totalorder %s13_s7, %s13_s7 }
   0x8   :  { %p81_p3 = scmp.ne.s32.totalorder %s13_s7, %s80_s15  ;;  %p86_p5 = scmp.lt.s32.totalorder %s80_s15, %s80_s15 }
   0xa   :  { %p87_p6 = por %p86_p5, %p85_p4 }
   0xc   :  { %p88_p7 = pnand %p87_p6, %p81_p3 }
   0xe   :  { %91 = shalt.err (!%p88_p7)
}
   0xf   :  { %s95_s16 = smov 128   ;;  %s96_s17 = smov 8  }
  0x10   :  { %18 = dma.hbm_to_vmem [thread:$0]  %s131_s0, 512, %s13_s7, [#allocation3], %s95_s16, %s95_s16, %s96_s17  }
  0x11   :  { %92 = dma.done.wait [#allocation3], 512  }
  0x12   :  { %93 = vsyncadd [#allocation3], 4294966784  ;;  %v24_v0 = vld [vmem:[#allocation2 + $0x10] sm:$0xff]  ;;  %v22_v1 = vld [vmem:[#allocation2] sm:$0xff] }
  0x13   :  { %v25_v2 = vld [vmem:[#allocation2 + $0x18] sm:$0xff]  ;;  %v28_v3 = vmul.f32 %v24_v0, %v24_v0  ;;  %v26_v4 = vmul.f32 %v22_v1, %v22_v1  ;;  %v23_v5 = vld [vmem:[#allocation2 + $0x8] sm:$0xff] }
  0x14   :  { %v29_v6 = vmul.f32 %v25_v2, %v25_v2  ;;  %v27_v7 = vmul.f32 %v23_v5, %v23_v5 }
  0x15   :  { %34 = vadd.xlane.f32.xlu1 %v28_v3  ;;  %30 = vadd.xlane.f32.xlu0 %v26_v4 }
  0x19   :  { %36 = vadd.xlane.f32.xlu1 %v29_v6  ;;  %32 = vadd.xlane.f32.xlu0 %v27_v7 }
  0xa2   :  { %v35_v8 = vpop.xlane.xlu1 %34  ;;  %v31_v9 = vpop.xlane.xlu0 %30 }
  0xa3   :  { %v40_v10 = vmax.f32 %v35_v8, 1e-24  ;;  %v38_v11 = vmax.f32 %v31_v9, 1e-24 }
  0xa5   :  { %62 = vrsqrt.f32 %v40_v10 }
  0xa6   :  { %64 = vrsqrt.f32 %v38_v11  ;;  %v37_v12 = vpop.xlane.xlu1 %36  ;;  %v33_v13 = vpop.xlane.xlu0 %32 }
  0xa7   :  { %v41_v14 = vmax.f32 %v37_v12, 1e-24  ;;  %v39_v15 = vmax.f32 %v33_v13, 1e-24 }
  0xa9   :  { %66 = vrsqrt.f32 %v41_v14 }
  0xaa   :  { %68 = vrsqrt.f32 %v39_v15 }
  0xaf   :  { %v63_v16 = vpop.eup %62 }
  0xb0   :  { %v65_v17 = vpop.eup %64  ;;  %v48_v18 = vmul.f32 %v63_v16, %v24_v0 }
  0xb1   :  { %v46_v19 = vmul.f32 %v65_v17, %v22_v1 }
  0xb2   :  { %52 = vst [vmem:[%s132_s1 + $0x10] sm:$0xff] %v48_v18 }
  0xb3   :  { %v67_v20 = vpop.eup %66  ;;  %50 = vst [vmem:[%s132_s1] sm:$0xff] %v46_v19 }
  0xb4   :  { %v69_v21 = vpop.eup %68  ;;  %v49_v22 = vmul.f32 %v67_v20, %v25_v2 }
  0xb5   :  { %v47_v23 = vmul.f32 %v69_v21, %v23_v5 }
  0xb6   :  { %53 = vst [vmem:[%s132_s1 + $0x18] sm:$0xff] %v49_v22 }
  0xb7   :  { %51 = vst [vmem:[%s132_s1 + $0x8] sm:$0xff] %v47_v23 }
  0xb8   :  { %58 = vsyncpa [#allocation3], 1 }

// kernel: contrastive_pallas.3
= control target key start
LH: loop header
LB: loop body
LE: loop exit
PB: predicated region body
PF: predicated region fallthrough
CT: control target
= control target key end

     0   :  { %vm159_vm4 = vcmask 7168   ;;  %s351_s0 = inlined_call_operand.vmem [shape: f32[32,128], index: 0, kind: input, shape index: {}]   ;;  %s352_s2 = inlined_call_operand.vmem [shape: f32[32,128], index: 2, kind: input, shape index: {}]   ;;  %s353_s1 = inlined_call_operand.vmem [shape: f32[32,128], index: 1, kind: input, shape index: {}]   ;;  %s354_s3 = inlined_call_operand.vmem [shape: f32[1,8,128], index: 3, kind: output, shape index: {0}]   ;;  %s355_s4 = inlined_call_operand.vmem [shape: f32[1,8,128], index: 4, kind: output, shape index: {1}]  }
   0x1   :  { %v18_v0 = vld [vmem:[%s351_s0 + $0x10] sm:$0xff]  ;;  %v16_v2 = vld [vmem:[%s351_s0] sm:$0xff]  ;;  %v17_v5 = vld [vmem:[%s351_s0 + $0x8] sm:$0xff] }
   0x2   :  { %v26_v1 = vld [vmem:[%s352_s2 + $0x10] sm:$0xff]  ;;  %v24_v4 = vld [vmem:[%s352_s2] sm:$0xff]  ;;  %v25_v6 = vld [vmem:[%s352_s2 + $0x8] sm:$0xff] }
   0x3   :  { %v78_v3 = vsub.f32 %v18_v0, %v26_v1  ;;  %v76_v7 = vsub.f32 %v16_v2, %v24_v4  ;;  %v77_v8 = vsub.f32 %v17_v5, %v25_v6  ;;  %v20_v9 = vld [vmem:[%s353_s1] sm:$0xff]  ;;  %v21_v10 = vld [vmem:[%s353_s1 + $0x8] sm:$0xff]  ;;  %v19_v11 = vld [vmem:[%s351_s0 + $0x18] sm:$0xff] }
   0x4   :  { %v28_v13 = vsub.f32 %v16_v2, %v20_v9  ;;  %v27_v14 = vld [vmem:[%s352_s2 + $0x18] sm:$0xff]  ;;  %v29_v17 = vsub.f32 %v17_v5, %v21_v10  ;;  %v22_v22 = vld [vmem:[%s353_s1 + $0x10] sm:$0xff] }
   0x5   :  { %v82_v12 = vadd.f32 1e-06, %v78_v3  ;;  %v80_v15 = vadd.f32 1e-06, %v76_v7  ;;  %v81_v16 = vadd.f32 1e-06, %v77_v8  ;;  %v79_v18 = vsub.f32 %v19_v11, %v27_v14 }
   0x6   :  { %v23_v19 = vld [vmem:[%s353_s1 + $0x18] sm:$0xff]  ;;  %v32_v21 = vadd.f32 1e-06, %v28_v13  ;;  %v33_v28 = vadd.f32 1e-06, %v29_v17  ;;  %v30_v29 = vsub.f32 %v18_v0, %v22_v22 }
   0x7   :  { %v86_v20 = vmul.f32 %v82_v12, %v82_v12  ;;  %v84_v23 = vmul.f32 %v80_v15, %v80_v15  ;;  %v83_v25 = vadd.f32 1e-06, %v79_v18  ;;  %v31_v26 = vsub.f32 %v19_v11, %v23_v19 }
   0x8   :  { %v36_v24 = vmul.f32 %v32_v21, %v32_v21  ;;  %v85_v27 = vmul.f32 %v81_v16, %v81_v16  ;;  %v37_v32 = vmul.f32 %v33_v28, %v33_v28  ;;  %v34_v33 = vadd.f32 1e-06, %v30_v29 }
   0x9   :  { %92 = vadd.xlane.f32.xlu1 %v86_v20  ;;  %88 = vadd.xlane.f32.xlu0 %v84_v23  ;;  %v87_v30 = vmul.f32 %v83_v25, %v83_v25  ;;  %v35_v31 = vadd.f32 1e-06, %v31_v26 }
   0xa   :  { %v38_v35 = vmul.f32 %v34_v33, %v34_v33 }
   0xb   :  { %v39_v34 = vmul.f32 %v35_v31, %v35_v31 }
   0xd   :  { %40 = vadd.xlane.f32.xlu1 %v36_v24  ;;  %90 = vadd.xlane.f32.xlu0 %v85_v27 }
  0x11   :  { %94 = vadd.xlane.f32.xlu1 %v87_v30  ;;  %42 = vadd.xlane.f32.xlu0 %v37_v32 }
  0x15   :  { %46 = vadd.xlane.f32.xlu1 %v39_v34  ;;  %44 = vadd.xlane.f32.xlu0 %v38_v35 }
  0x96   :  { %v93_v36 = vpop.xlane.xlu1 %92  ;;  %v89_v37 = vpop.xlane.xlu0 %88 }
  0x97   :  { %212 = vrsqrt.f32 %v93_v36  ;;  %vm112_vm0 = vcmp.eq.f32.partialorder %v93_v36, inf  ;;  %vm114_vm1 = vcmp.eq.f32.partialorder %v93_v36, 0.0  ;;  %vm98_vm2 = vcmp.eq.f32.partialorder %v89_v37, inf }
  0x98   :  { %214 = vrsqrt.f32 %v89_v37  ;;  %v115_v48 = vand.u32 2147483648, %v93_v36  ;;  %v101_v49 = vand.u32 2147483648, %v89_v37  ;;  %vm100_vm3 = vcmp.eq.f32.partialorder %v89_v37, 0.0 }
  0x9a   :  { %v289_v38 = vpop.xlane.xlu1 %40  ;;  %v91_v39 = vpop.xlane.xlu0 %90 }
  0x9b   :  { %216 = vrsqrt.f32 %v289_v38  ;;  %vm50_vm5 = vcmp.eq.f32.partialorder %v289_v38, inf  ;;  %v53_v52 = vand.u32 2147483648, %v289_v38  ;;  %vm105_vm6 = vcmp.eq.f32.partialorder %v91_v39, inf }
  0x9c   :  { %218 = vrsqrt.f32 %v91_v39  ;;  %vm52_vm7 = vcmp.eq.f32.partialorder %v289_v38, 0.0  ;;  %v108_v59 = vand.u32 2147483648, %v91_v39  ;;  %vm107_vm8 = vcmp.eq.f32.partialorder %v91_v39, 0.0 }
  0x9e   :  { %v95_v40 = vpop.xlane.xlu1 %94  ;;  %v292_v41 = vpop.xlane.xlu0 %42 }
  0x9f   :  { %220 = vrsqrt.f32 %v95_v40  ;;  %vm119_vm9 = vcmp.eq.f32.partialorder %v95_v40, inf  ;;  %vm121_vm10 = vcmp.eq.f32.partialorder %v95_v40, 0.0  ;;  %v122_v61 = vand.u32 2147483648, %v95_v40 }
  0xa0   :  { %222 = vrsqrt.f32 %v292_v41  ;;  %vm57_vm11 = vcmp.eq.f32.partialorder %v292_v41, inf  ;;  %v60_v0 = vand.u32 2147483648, %v292_v41  ;;  %vm59_vm12 = vcmp.eq.f32.partialorder %v292_v41, 0.0 }
  0xa1   :  { %v213_v42 = vpop.eup %212 }
  0xa2   :  { %v215_v43 = vpop.eup %214  ;;  %v111_v44 = vmul.f32 %v213_v42, %v93_v36  ;;  %v295_v45 = vpop.xlane.xlu1 %46 }
  0xa3   :  { %v97_v46 = vmul.f32 %v215_v43, %v89_v37  ;;  %v297_v47 = vpop.xlane.xlu0 %44  ;;  %224 = vrsqrt.f32 %v295_v45  ;;  %vm71_vm13 = vcmp.eq.f32.partialorder %v295_v45, inf  ;;  %vm73_vm14 = vcmp.eq.f32.partialorder %v295_v45, 0.0 }
  0xa4   :  { %226 = vrsqrt.f32 %v297_v47  ;;  %v113_v50 = vsel %vm112_vm0, %v93_v36, %v111_v44  ;;  %vm64_vm15 = vcmp.eq.f32.partialorder %v297_v47, inf  ;;  %v67_v11 = vand.u32 2147483648, %v297_v47 }
  0xa5   :  { %v217_v51 = vpop.eup %216  ;;  %v99_v53 = vsel %vm98_vm2, %v89_v37, %v97_v46  ;;  %v116_v54 = vsel %vm114_vm1, %v115_v48, %v113_v50  ;;  %v74_v21 = vand.u32 2147483648, %v295_v45  ;;  %vm66_vm0 = vcmp.eq.f32.partialorder %v297_v47, 0.0 }
  0xa6   :  { %v219_v55 = vpop.eup %218  ;;  %v49_v56 = vmul.f32 %v217_v51, %v289_v38  ;;  %v102_v57 = vsel %vm100_vm3, %v101_v49, %v99_v53  ;;  %v126_v62 = vsub.f32 1.0, %v116_v54 }
  0xa7   :  { %v104_v58 = vmul.f32 %v219_v55, %v91_v39  ;;  %v124_v60 = vsub.f32 1.0, %v102_v57 }
  0xa8   :  { %v51_v5 = vsel %vm50_vm5, %v289_v38, %v49_v56  ;;  %v130_v10 = vmax.f32 %v126_v62, 0.0 }
  0xa9   :  { %v221_v63 = vpop.eup %220  ;;  %v106_v1 = vsel %vm105_vm6, %v91_v39, %v104_v58  ;;  %v128_v8 = vmax.f32 %v124_v60, 0.0  ;;  %v54_v15 = vsel %vm52_vm7, %v53_v52, %v51_v5 }
  0xaa   :  { %v223_v2 = vpop.eup %222  ;;  %v118_v3 = vmul.f32 %v221_v63, %v95_v40  ;;  %v109_v4 = vsel %vm107_vm8, %v108_v59, %v106_v1  ;;  %v160_v29 = vsel %vm159_vm4, %v54_v15, 0.0  ;;  %v183_v30 = vsel %vm159_vm4, %v130_v10, 0.0 }
  0xab   :  { %v56_v6 = vmul.f32 %v223_v2, %v292_v41  ;;  %v125_v7 = vsub.f32 1.0, %v109_v4  ;;  %v180_v23 = vsel %vm159_vm4, %v128_v8, 0.0 }
  0xac   :  { %v120_v9 = vsel %vm119_vm9, %v95_v40, %v118_v3 }
  0xad   :  { %v225_v12 = vpop.eup %224  ;;  %v123_v13 = vsel %vm121_vm10, %v122_v61, %v120_v9  ;;  %v129_v14 = vmax.f32 %v125_v7, 0.0  ;;  %v58_v16 = vsel %vm57_vm11, %v292_v41, %v56_v6 }
  0xae   :  { %v227_v17 = vpop.eup %226  ;;  %v127_v18 = vsub.f32 1.0, %v123_v13  ;;  %v61_v19 = vsel %vm59_vm12, %v60_v0, %v58_v16  ;;  %v70_v20 = vmul.f32 %v225_v12, %v295_v45 }
  0xaf   :  { %v63_v22 = vmul.f32 %v227_v17, %v297_v47  ;;  %v181_v24 = vsel %vm159_vm4, %v129_v14, 0.0  ;;  %v161_v25 = vsel %vm159_vm4, %v61_v19, 0.0 }
  0xb0   :  { %v131_v26 = vmax.f32 %v127_v18, 0.0  ;;  %v182_v27 = vadd.f32 %v181_v24, %v180_v23  ;;  %v72_v28 = vsel %vm71_vm13, %v295_v45, %v70_v20  ;;  %v162_v32 = vadd.f32 %v161_v25, %v160_v29 }
  0xb1   :  { %v65_v31 = vsel %vm64_vm15, %v297_v47, %v63_v22  ;;  %v75_v36 = vsel %vm73_vm14, %v74_v21, %v72_v28 }
  0xb2   :  { %v184_v33 = vadd.f32 %v183_v30, %v182_v27  ;;  %v185_v34 = vsel %vm159_vm4, %v131_v26, 0.0  ;;  %v68_v35 = vsel %vm66_vm0, %v67_v11, %v65_v31  ;;  %v165_v40 = vsel %vm159_vm4, %v75_v36, 0.0 }
  0xb3   :  { %v163_v37 = vsel %vm159_vm4, %v68_v35, 0.0 }
  0xb4   :  { %v186_v38 = vadd.f32 %v185_v34, %v184_v33  ;;  %v164_v39 = vadd.f32 %v163_v37, %v162_v32 }
  0xb6   :  { %187 = vadd.xlane.f32.xlu1 %v186_v38  ;;  %v166_v41 = vadd.f32 %v165_v40, %v164_v39 }
  0xb8   :  { %167 = vadd.xlane.f32.xlu0 %v166_v41 }
 0x143   :  { %v188_v42 = vpop.xlane.xlu1 %187 }
 0x144   :  { %v189_v43 = vrot.slane %v188_v42, 4 }
 0x145   :  { %v168_v44 = vpop.xlane.xlu0 %167 }
 0x146   :  { %v190_v46 = vadd.f32 %v189_v43, %v188_v42  ;;  %v169_v47 = vrot.slane %v168_v44, 4 }
 0x148   :  { %v191_v48 = vrot.slane %v190_v46, 2  ;;  %v170_v49 = vadd.f32 %v169_v47, %v168_v44 }
 0x14a   :  { %v192_v50 = vadd.f32 %v191_v48, %v190_v46  ;;  %v171_v51 = vrot.slane %v170_v49, 2 }
 0x14c   :  { %v172_v45 = vadd.f32 %v171_v51, %v170_v49  ;;  %v193_v52 = vrot.slane %v192_v50, 1 }
 0x14e   :  { %v173_v53 = vrot.slane %v172_v45, 1  ;;  %v194_v55 = vadd.f32 %v193_v52, %v192_v50 }
 0x150   :  { %v174_v54 = vadd.f32 %v173_v53, %v172_v45 }
 0x152   :  { %208 = vpush %v174_v54 }
 0x153   :  { %210 = vpush %v194_v55 }
 0x183   :  { %s209_s0 = spop %208 }
 0x184   :  { %v196_v56 = vstv %s209_s0  ;;  %s211_s1 = spop %210 }
 0x185   :  { %197 = vst [vmem:[%s354_s3] sm:$0xff] %v196_v56  ;;  %v198_v57 = vstv %s211_s1 }
 0x186   :  { %199 = vst [vmem:[%s355_s4] sm:$0xff] %v198_v57 }

</bundles_post_ra>
